<compile_context>
chip_gen: v7x
topology: tpu7x:2x2x1
jax: 0.10.0
libtpu: 0.0.40
codegen_flags: <defaults>
</compile_context>

<pallas_src>
import math
import functools

import jax
import jax.numpy as jnp
from jax.experimental import pallas as pl
from jax.experimental.pallas import tpu as pltpu


def cross_attention_kernel(ctx_ref, tgt_ref, wq_t_ref, wkv_t_ref, wo_t_ref,
                           vec_ref, o_ref, *, bt, ctx_len, tgt_len, eps):
    E = wq_t_ref.shape[0]
    scale = 1.0 / math.sqrt(E)

    ctx = ctx_ref[...]           # (bt*S, E) flattened slab
    tgt = tgt_ref[...]           # (bt*L, E) flattened slab
    vecs = vec_ref[...]          # (6, E): rows = bq, bk, bv, bo, gamma, beta
    bq, bk, bv, bo = vecs[0:1], vecs[1:2], vecs[2:3], vecs[3:4]
    gamma, beta = vecs[4:5], vecs[5:6]

    # --- in-projections: batch folded into sublane dim, K/V share one MXU pass ---
    # Fold the attention scale into Q (cheaper than scaling the (L,S) score matrix).
    q = (jnp.dot(tgt, wq_t_ref[...], preferred_element_type=jnp.float32) + bq) * scale
    kv = jnp.dot(ctx, wkv_t_ref[...], preferred_element_type=jnp.float32)   # (bt*S, 2E)
    k = kv[:, :E] + bk
    v = kv[:, E:] + bv

    # --- single-head scaled dot-product attention (needs per-batch structure) ---
    qb = q.reshape(bt, tgt_len, E)
    kb = k.reshape(bt, ctx_len, E)
    vb = v.reshape(bt, ctx_len, E)
    s = jnp.einsum("ble,bse->bls", qb, kb,
                   preferred_element_type=jnp.float32)                       # (bt, L, S)
    s = s - jnp.max(s, axis=-1, keepdims=True)
    p = jnp.exp(s)
    p = p * pl.reciprocal(jnp.sum(p, axis=-1, keepdims=True), approx=True)
    att = jnp.einsum("bls,bse->ble", p, vb,
                     preferred_element_type=jnp.float32)                     # (bt, L, E)

    # --- output projection + residual + LayerNorm on the flattened slab ---
    out = jnp.dot(att.reshape(bt * tgt_len, E), wo_t_ref[...],
                  preferred_element_type=jnp.float32) + bo
    out = out + tgt.astype(jnp.float32)
    mean = jnp.mean(out, axis=-1, keepdims=True)
    var = jnp.mean((out - mean) ** 2, axis=-1, keepdims=True)
    norm = (out - mean) * jax.lax.rsqrt(var + eps)
    o_ref[...] = (norm * gamma + beta).astype(o_ref.dtype)


def cross_attention(context, target, params, *, eps=1e-5, block_b=None):
    """context: (B, S, E)  target: (B, L, E)  ->  (B, L, E)"""
    B, S, E = context.shape
    _, L, _ = target.shape
    wq, wk, wv, wo, bq, bk, bv, bo, gamma, beta = params

    if block_b is None:
        # Keep >=2 grid steps when possible (v7x: 2 TensorCores/chip can split a
        # "parallel" axis); otherwise collapse everything into a single step.
        block_b = B // 2 if (B % 2 == 0 and B >= 2) else B
    assert B % block_b == 0, "block_b must divide the batch size"
    grid_b = B // block_b

    # Wrapper-side layout plumbing (one-time XLA ops, not per-grid-step work):
    #   pre-transpose weights, concatenate Wk/Wv, pack the six vectors into one
    #   (6, E) slab, and fold the batch dim into the sublane dim.
    wq_t = wq.T                                       # (E, E)
    wkv_t = jnp.concatenate([wk.T, wv.T], axis=1)     # (E, 2E)
    wo_t = wo.T                                       # (E, E)
    vecs = jnp.stack([x.reshape(-1) for x in (bq, bk, bv, bo, gamma, beta)])  # (6, E)
    ctx2 = context.reshape(B * S, E)
    tgt2 = target.reshape(B * L, E)

    flops = 4 * B * L * E * E + 4 * B * S * E * E + 4 * B * L * S * E
    bytes_accessed = 4 * (B * S * E + 2 * B * L * E + 4 * E * E + 6 * E)

    out2 = pl.pallas_call(
        functools.partial(cross_attention_kernel, bt=block_b,
                          ctx_len=S, tgt_len=L, eps=eps),
        out_shape=jax.ShapeDtypeStruct((B * L, E), target.dtype),
        grid_spec=pltpu.PrefetchScalarGridSpec(
            num_scalar_prefetch=0,
            grid=(grid_b,),
            in_specs=[
                pl.BlockSpec((block_b * S, E), lambda b: (b, 0)),   # context slab
                pl.BlockSpec((block_b * L, E), lambda b: (b, 0)),   # target slab
                pl.BlockSpec((E, E), lambda b: (0, 0)),             # Wq^T
                pl.BlockSpec((E, 2 * E), lambda b: (0, 0)),         # [Wk^T | Wv^T]
                pl.BlockSpec((E, E), lambda b: (0, 0)),             # Wo^T
                pl.BlockSpec((6, E), lambda b: (0, 0)),             # bq,bk,bv,bo,gamma,beta
            ],
            out_specs=pl.BlockSpec((block_b * L, E), lambda b: (b, 0)),
        ),
        compiler_params=pltpu.CompilerParams(
            dimension_semantics=("parallel",)),
        cost_estimate=pl.CostEstimate(
            flops=flops,
            transcendentals=B * L * S + 2 * B * L,
            bytes_accessed=bytes_accessed),
    )(ctx2, tgt2, wq_t, wkv_t, wo_t, vecs)
    return out2.reshape(B, L, E)


def cross_attention_ref(context, target, params, *, eps=1e-5):
    """Pure-JAX reference mirroring PyTorch semantics (num_heads=1)."""
    wq, wk, wv, wo, bq, bk, bv, bo, gamma, beta = params
    E = target.shape[-1]
    q = target @ wq.T + bq
    k = context @ wk.T + bk
    v = context @ wv.T + bv
    s = jnp.einsum("ble,bse->bls", q, k) / math.sqrt(E)
    p = jax.nn.softmax(s, axis=-1)
    att = jnp.einsum("bls,bse->ble", p, v)
    out = att @ wo.T + bo + target
    mean = out.mean(-1, keepdims=True)
    var = ((out - mean) ** 2).mean(-1, keepdims=True)
    return (out - mean) / jnp.sqrt(var + eps) * gamma + beta


if __name__ == "__main__":
    # Small deterministic shapes consistent with the forward pass.
    B, S, L, E = 2, 16, 8, 32   # batch, context len, target len, units
    key = jax.random.PRNGKey(0)
    k_ctx, k_tgt, k_in, k_out = jax.random.split(key, 4)

    context = jax.random.normal(k_ctx, (B, S, E), dtype=jnp.float32)
    target = jax.random.normal(k_tgt, (B, L, E), dtype=jnp.float32)

    # Deterministic parameter init (shapes match nn.MultiheadAttention / nn.LayerNorm).
    in_proj_w = jax.random.normal(k_in, (3 * E, E), dtype=jnp.float32) * 0.05
    wq, wk, wv = in_proj_w[:E], in_proj_w[E:2 * E], in_proj_w[2 * E:]
    bq = jnp.zeros((E,), jnp.float32)
    bk = jnp.zeros((E,), jnp.float32)
    bv = jnp.zeros((E,), jnp.float32)
    wo = jax.random.normal(k_out, (E, E), dtype=jnp.float32) * 0.05
    bo = jnp.zeros((E,), jnp.float32)
    gamma = jnp.ones((E,), jnp.float32)
    beta = jnp.zeros((E,), jnp.float32)
    params = (wq, wk, wv, wo, bq, bk, bv, bo, gamma, beta)

    out = cross_attention(context, target, params)
    jax.block_until_ready(out)

    ref = cross_attention_ref(context, target, params)
    assert out.shape == (B, L, E)
    # approx=True softmax reciprocal loosens bitwise parity slightly; still tight.
    assert jnp.allclose(out, ref, atol=2e-3, rtol=2e-3), "mismatch vs reference"

    print("KERNEL_OK")
</pallas_src>

<mosaic_0001>
module attributes {stable_mosaic.version = 11 : i64} {
  func.func @cross_attention_kernel(%arg0: i32, %arg1: memref<16x32xf32, #tpu.memory_space<vmem>>, %arg2: memref<8x32xf32, #tpu.memory_space<vmem>>, %arg3: memref<32x32xf32, #tpu.memory_space<vmem>>, %arg4: memref<32x64xf32, #tpu.memory_space<vmem>>, %arg5: memref<32x32xf32, #tpu.memory_space<vmem>>, %arg6: memref<6x32xf32, #tpu.memory_space<vmem>>, %arg7: memref<8x32xf32, #tpu.memory_space<vmem>>) attributes {dimension_semantics = [#tpu.dimension_semantics<parallel>], iteration_bounds = array<i64: 2>, scalar_prefetch = 0 : i64, scratch_operands = 0 : i64, tpu.core_type = #tpu.core_type<tc>, window_params = [{transform_indices = @transform_0, window_bounds = array<i64: 16, 32>}, {transform_indices = @transform_1, window_bounds = array<i64: 8, 32>}, {pipeline_mode = #tpu.pipeline_mode<synchronous>, transform_indices = @transform_2, window_bounds = array<i64: 32, 32>}, {pipeline_mode = #tpu.pipeline_mode<synchronous>, transform_indices = @transform_3, window_bounds = array<i64: 32, 64>}, {pipeline_mode = #tpu.pipeline_mode<synchronous>, transform_indices = @transform_4, window_bounds = array<i64: 32, 32>}, {pipeline_mode = #tpu.pipeline_mode<synchronous>, transform_indices = @transform_5, window_bounds = array<i64: 6, 32>}, {transform_indices = @transform_6, window_bounds = array<i64: 8, 32>}]} {
    %c0 = arith.constant 0 : index
    %c0_0 = arith.constant 0 : index
    %0 = vector.load %arg1[%c0, %c0_0] : memref<16x32xf32, #tpu.memory_space<vmem>>, vector<16x32xf32>
    %c0_1 = arith.constant 0 : index
    %c0_2 = arith.constant 0 : index
    %1 = vector.load %arg2[%c0_1, %c0_2] : memref<8x32xf32, #tpu.memory_space<vmem>>, vector<8x32xf32>
    %c0_3 = arith.constant 0 : index
    %c0_4 = arith.constant 0 : index
    %2 = vector.load %arg6[%c0_3, %c0_4] : memref<6x32xf32, #tpu.memory_space<vmem>>, vector<6x32xf32>
    %3 = vector.extract_strided_slice %2 {offsets = [0, 0], sizes = [1, 32], strides = [1, 1]} : vector<6x32xf32> to vector<1x32xf32>
    %4 = vector.extract_strided_slice %2 {offsets = [1, 0], sizes = [1, 32], strides = [1, 1]} : vector<6x32xf32> to vector<1x32xf32>
    %5 = vector.extract_strided_slice %2 {offsets = [2, 0], sizes = [1, 32], strides = [1, 1]} : vector<6x32xf32> to vector<1x32xf32>
    %6 = vector.extract_strided_slice %2 {offsets = [3, 0], sizes = [1, 32], strides = [1, 1]} : vector<6x32xf32> to vector<1x32xf32>
    %7 = vector.extract_strided_slice %2 {offsets = [4, 0], sizes = [1, 32], strides = [1, 1]} : vector<6x32xf32> to vector<1x32xf32>
    %8 = vector.extract_strided_slice %2 {offsets = [5, 0], sizes = [1, 32], strides = [1, 1]} : vector<6x32xf32> to vector<1x32xf32>
    %c0_5 = arith.constant 0 : index
    %c0_6 = arith.constant 0 : index
    %9 = vector.load %arg3[%c0_5, %c0_6] : memref<32x32xf32, #tpu.memory_space<vmem>>, vector<32x32xf32>
    %cst = arith.constant dense<0.000000e+00> : vector<8x32xf32>
    %10 = tpu.matmul %1, %9, %cst {dimension_numbers = #tpu.dot_dimension_numbers<[1], [0], [0], [1], [0, 0, 1, 1], [], []>} : vector<8x32xf32>, vector<32x32xf32>, vector<8x32xf32> -> vector<8x32xf32>
    %11 = vector.broadcast %3 : vector<1x32xf32> to vector<8x32xf32>
    %12 = arith.addf %10, %11 : vector<8x32xf32>
    %cst_7 = arith.constant 0.176776692 : f32
    %13 = vector.broadcast %cst_7 : f32 to vector<8x32xf32>
    %14 = arith.mulf %12, %13 : vector<8x32xf32>
    %c0_8 = arith.constant 0 : index
    %c0_9 = arith.constant 0 : index
    %15 = vector.load %arg4[%c0_8, %c0_9] : memref<32x64xf32, #tpu.memory_space<vmem>>, vector<32x64xf32>
    %cst_10 = arith.constant dense<0.000000e+00> : vector<16x64xf32>
    %16 = tpu.matmul %0, %15, %cst_10 {dimension_numbers = #tpu.dot_dimension_numbers<[1], [0], [0], [1], [0, 0, 1, 1], [], []>} : vector<16x32xf32>, vector<32x64xf32>, vector<16x64xf32> -> vector<16x64xf32>
    %17 = vector.extract_strided_slice %16 {offsets = [0, 0], sizes = [16, 32], strides = [1, 1]} : vector<16x64xf32> to vector<16x32xf32>
    %18 = vector.broadcast %4 : vector<1x32xf32> to vector<16x32xf32>
    %19 = arith.addf %17, %18 : vector<16x32xf32>
    %20 = vector.extract_strided_slice %16 {offsets = [0, 32], sizes = [16, 32], strides = [1, 1]} : vector<16x64xf32> to vector<16x32xf32>
    %21 = vector.broadcast %5 : vector<1x32xf32> to vector<16x32xf32>
    %22 = arith.addf %20, %21 : vector<16x32xf32>
    %23 = vector.shape_cast %14 : vector<8x32xf32> to vector<1x8x32xf32>
    %24 = vector.shape_cast %19 : vector<16x32xf32> to vector<1x16x32xf32>
    %25 = vector.shape_cast %22 : vector<16x32xf32> to vector<1x16x32xf32>
    "tpu.trace_start"() <{level = 10 : i32, message = "ble,bse->bls"}> : () -> ()
    %cst_11 = arith.constant dense<0.000000e+00> : vector<1x8x16xf32>
    %26 = tpu.matmul %23, %24, %cst_11 {dimension_numbers = #tpu.dot_dimension_numbers<[2], [2], [1], [1], [0, 0, 0, 1, 1, 1], [0], [0]>} : vector<1x8x32xf32>, vector<1x16x32xf32>, vector<1x8x16xf32> -> vector<1x8x16xf32>
    "tpu.trace_stop"() : () -> ()
    %cst_12 = arith.constant dense<0xFF800000> : vector<1x8xf32>
    %27 = vector.multi_reduction <maximumf>, %26, %cst_12 [2] : vector<1x8x16xf32> to vector<1x8xf32>
    %28 = vector.shape_cast %27 : vector<1x8xf32> to vector<1x8x1xf32>
    %29 = vector.broadcast %28 : vector<1x8x1xf32> to vector<1x8x16xf32>
    %30 = arith.subf %26, %29 : vector<1x8x16xf32>
    %31 = math.exp %30 : vector<1x8x16xf32>
    %cst_13 = arith.constant dense<0.000000e+00> : vector<1x8xf32>
    %32 = vector.multi_reduction <add>, %31, %cst_13 [2] : vector<1x8x16xf32> to vector<1x8xf32>
    %33 = vector.shape_cast %32 : vector<1x8xf32> to vector<1x8x1xf32>
    %34 = tpu.reciprocal %33 {approx = true} : vector<1x8x1xf32> -> vector<1x8x1xf32>
    %35 = vector.broadcast %34 : vector<1x8x1xf32> to vector<1x8x16xf32>
    %36 = arith.mulf %31, %35 : vector<1x8x16xf32>
    "tpu.trace_start"() <{level = 10 : i32, message = "bls,bse->ble"}> : () -> ()
    %cst_14 = arith.constant dense<0.000000e+00> : vector<1x8x32xf32>
    %37 = tpu.matmul %36, %25, %cst_14 {dimension_numbers = #tpu.dot_dimension_numbers<[2], [1], [1], [2], [0, 0, 0, 1, 1, 2], [0], [0]>} : vector<1x8x16xf32>, vector<1x16x32xf32>, vector<1x8x32xf32> -> vector<1x8x32xf32>
    "tpu.trace_stop"() : () -> ()
    %38 = vector.shape_cast %37 : vector<1x8x32xf32> to vector<8x32xf32>
    %c0_15 = arith.constant 0 : index
    %c0_16 = arith.constant 0 : index
    %39 = vector.load %arg5[%c0_15, %c0_16] : memref<32x32xf32, #tpu.memory_space<vmem>>, vector<32x32xf32>
    %cst_17 = arith.constant dense<0.000000e+00> : vector<8x32xf32>
    %40 = tpu.matmul %38, %39, %cst_17 {dimension_numbers = #tpu.dot_dimension_numbers<[1], [0], [0], [1], [0, 0, 1, 1], [], []>} : vector<8x32xf32>, vector<32x32xf32>, vector<8x32xf32> -> vector<8x32xf32>
    %41 = vector.broadcast %6 : vector<1x32xf32> to vector<8x32xf32>
    %42 = arith.addf %40, %41 : vector<8x32xf32>
    %43 = arith.addf %42, %1 : vector<8x32xf32>
    %cst_18 = arith.constant dense<0.000000e+00> : vector<8xf32>
    %44 = vector.multi_reduction <add>, %43, %cst_18 [1] : vector<8x32xf32> to vector<8xf32>
    %45 = vector.shape_cast %44 : vector<8xf32> to vector<8x1xf32>
    %cst_19 = arith.constant 3.200000e+01 : f32
    %46 = vector.broadcast %cst_19 : f32 to vector<8x1xf32>
    %47 = arith.divf %45, %46 : vector<8x1xf32>
    %48 = vector.broadcast %47 : vector<8x1xf32> to vector<8x32xf32>
    %49 = arith.subf %43, %48 : vector<8x32xf32>
    %50 = arith.mulf %49, %49 : vector<8x32xf32>
    %cst_20 = arith.constant dense<0.000000e+00> : vector<8xf32>
    %51 = vector.multi_reduction <add>, %50, %cst_20 [1] : vector<8x32xf32> to vector<8xf32>
    %52 = vector.shape_cast %51 : vector<8xf32> to vector<8x1xf32>
    %cst_21 = arith.constant 3.200000e+01 : f32
    %53 = vector.broadcast %cst_21 : f32 to vector<8x1xf32>
    %54 = arith.divf %52, %53 : vector<8x1xf32>
    %55 = vector.broadcast %47 : vector<8x1xf32> to vector<8x32xf32>
    %56 = arith.subf %43, %55 : vector<8x32xf32>
    %cst_22 = arith.constant 9.99999974E-6 : f32
    %57 = vector.broadcast %cst_22 : f32 to vector<8x1xf32>
    %58 = arith.addf %54, %57 : vector<8x1xf32>
    %59 = math.rsqrt %58 : vector<8x1xf32>
    %60 = vector.broadcast %59 : vector<8x1xf32> to vector<8x32xf32>
    %61 = arith.mulf %56, %60 : vector<8x32xf32>
    %62 = vector.broadcast %7 : vector<1x32xf32> to vector<8x32xf32>
    %63 = arith.mulf %61, %62 : vector<8x32xf32>
    %64 = vector.broadcast %8 : vector<1x32xf32> to vector<8x32xf32>
    %65 = arith.addf %63, %64 : vector<8x32xf32>
    %c0_23 = arith.constant 0 : index
    %c0_24 = arith.constant 0 : index
    %66 = vector.load %arg7[%c0_23, %c0_24] : memref<8x32xf32, #tpu.memory_space<vmem>>, vector<8x32xf32>
    tpu.vector_store %arg7[%c0_23, %c0_24], %65 {strides = array<i32>} : memref<8x32xf32, #tpu.memory_space<vmem>>, vector<8x32xf32>,
    return
  }
  func.func @transform_0(%arg0: i32) -> (i32, i32) {
    %c0_i32 = arith.constant 0 : i32
    %c0_i32_0 = arith.constant 0 : i32
    return %arg0, %c0_i32 : i32, i32
  }
  func.func @transform_1(%arg0: i32) -> (i32, i32) {
    %c0_i32 = arith.constant 0 : i32
    %c0_i32_0 = arith.constant 0 : i32
    return %arg0, %c0_i32 : i32, i32
  }
  func.func @transform_2(%arg0: i32) -> (i32, i32) {
    %c0_i32 = arith.constant 0 : i32
    %c0_i32_0 = arith.constant 0 : i32
    %c0_i32_1 = arith.constant 0 : i32
    return %c0_i32, %c0_i32_0 : i32, i32
  }
  func.func @transform_3(%arg0: i32) -> (i32, i32) {
    %c0_i32 = arith.constant 0 : i32
    %c0_i32_0 = arith.constant 0 : i32
    %c0_i32_1 = arith.constant 0 : i32
    return %c0_i32, %c0_i32_0 : i32, i32
  }
  func.func @transform_4(%arg0: i32) -> (i32, i32) {
    %c0_i32 = arith.constant 0 : i32
    %c0_i32_0 = arith.constant 0 : i32
    %c0_i32_1 = arith.constant 0 : i32
    return %c0_i32, %c0_i32_0 : i32, i32
  }
  func.func @transform_5(%arg0: i32) -> (i32, i32) {
    %c0_i32 = arith.constant 0 : i32
    %c0_i32_0 = arith.constant 0 : i32
    %c0_i32_1 = arith.constant 0 : i32
    return %c0_i32, %c0_i32_0 : i32, i32
  }
  func.func @transform_6(%arg0: i32) -> (i32, i32) {
    %c0_i32 = arith.constant 0 : i32
    %c0_i32_0 = arith.constant 0 : i32
    return %arg0, %c0_i32 : i32, i32
  }
}

</mosaic_0001>

<bundles_post_ra>
// kernel: tpu_custom_call.1
= control target key start
LH: loop header
LB: loop body
LE: loop exit
PB: predicated region body
PF: predicated region fallthrough
CT: control target
= control target key end

     0   :  { %s1820_s0 = inlined_call_operand.hbm [shape: f32[32,32], index: 0, kind: input, shape index: {}]   ;;  %s1821_s1 = inlined_call_operand.hbm [shape: f32[16,32], index: 1, kind: input, shape index: {}]   ;;  %s1822_s2 = inlined_call_operand.hbm [shape: f32[32,32], index: 2, kind: input, shape index: {}]   ;;  %s1823_s3 = inlined_call_operand.hbm [shape: f32[32,64], index: 3, kind: input, shape index: {}]   ;;  %s1824_s4 = inlined_call_operand.hbm [shape: f32[32,32], index: 4, kind: input, shape index: {}]   ;;  %s1825_s5 = inlined_call_operand.vmem [shape: f32[6,32], index: 5, kind: input, shape index: {}]   ;;  %s1826_s6 = inlined_call_operand.hbm [shape: f32[16,32], index: 6, kind: output, shape index: {}]  }
   0x1   :  { %1832 = sst [smem:[#allocation17_spill]] %s1820_s0 }
   0x2   :  { %1833 = sst [smem:[#allocation18_spill]] %s1822_s2 }
   0x3   :  { %1834 = sst [smem:[#allocation19_spill]] %s1823_s3 }
   0x4   :  { %1835 = sst [smem:[#allocation20_spill]] %s1824_s4 }
   0x5   :  { %11 = vsyncpa [#allocation3], 0 }
   0x6   :  { %13 = vsyncpa [#allocation3 + $0x1], 0 }
   0x7   :  { %14 = vsyncpa [#allocation6], 0 }
   0x8   :  { %16 = vsyncpa [#allocation6 + $0x1], 0 }
   0x9   :  { %17 = vsyncpa [#allocation9], 0 }
   0xa   :  { %18 = vsyncpa [#allocation4], 0 }
   0xb   :  { %20 = vsyncpa [#allocation4 + $0x1], 0  ;;  %s1452_s21 = smov 0   ;;  %s1454_s22 = smov 0  }
   0xc   :  { %s1456_s23 = smov 0   ;;  %s1458_s24 = smov 0  }
   0xd LB: > { %s1473_s25 = sadd.s32 4294967295, %s1402_s24   ;;  %s953_s26 = sadd.s32 4294967294, %s1402_s24   ;;  %s1402_s24 = sphi %s1458_s24, %s1862_s24   ;;  %s1398_s23 = sphi %s1456_s23, %s1861_s23   ;;  %s1394_s22 = sphi %s1454_s22, %s1860_s22   ;;  %s1390_s21 = sphi %s1452_s21, %s1859_s21  }
   0xe   : > { %p46_p0 = scmp.ne.s32.totalorder %s1394_s22, %s1390_s21  ;;  %p1827_p1 = scmp.eq.s32.totalorder %s1473_s25, 0 }
   0xf   : > { %p186_p3 = scmp.eq.s32.totalorder %s953_s26, 1  ;;  %p954_p5 = scmp.ge.s32.totalorder %s1402_s24, 1 }
  0x10   : > { %p1482_p4 = por %p1827_p1, %p46_p0  ;;  %p193_p7 = scmp.lt.s32.totalorder %s1402_s24, 3 }
  0x11   : > { %p1487_p6 = por %p186_p3, %p46_p0  ;;  %s1404_s30 = smov [#allocation7]  }
  0x12   : > { %s1836_s27 = scalar_select %p1482_p4, 1, 0 }
  0x13   : > { %s1837_s28 = scalar_select %p1487_p6, 1, 0 }
  0x14   : > { %p1492_p8 = pnand %p954_p5, %p193_p7  ;;  %s205_s7 = sshll.u32 %s1404_s30, 4  ;;  %s1496_s7 = int_to_ptr.vmem [resolvable:$true] %s205_s7 }
  0x15   : > { %s1405_s9 = smov [#allocation8]   ;;  %s1406_s11 = smov [#allocation10]  }
  0x16   : > { %s1838_s29 = scalar_select %p1492_p8, 1, 0 }
  0x17   : > { %p1098_p9 = pneg %p1492_p8  ;;  %s218_s10 = sshll.u32 %s1405_s9, 4  ;;  %s1507_s10 = int_to_ptr.vmem [resolvable:$true] %s218_s10 }
  0x18   : > { %s1509_s12 = sshll.u32 %s1406_s11, 4  ;;  %s1840_s2 = sld [smem:[#allocation18_spill]]  ;;  %s232_s12 = int_to_ptr.vmem [resolvable:$true] %s1509_s12 }
  0x19   : > { %p1503_p11 = pnand %p1098_p9, %p1827_p1 }
  0x1b   : > { %p1519_p13 = pneg %p1503_p11 }
  0x1e   : > { %s1180_s15 = scalar_lea.hbm %s1840_s2, 512 }
  0x1f   : > { %p1181_p12 = scmp.ne.s32.totalorder %s1840_s2, %s1180_s15  ;;  %p1187_p5 = scmp.lt.u32.totalorder %s1180_s15, %s1840_s2 }
  0x21   : > { %p1183_p0 = pnand %p1519_p13, %p1181_p12 }
  0x23   : > { %p1184_p3 = pneg %p1183_p0 }
  0x25   : > { %p1189_p7 = pnand %p1187_p5, %p1184_p3 }
  0x27   : > { %1192 = shalt.err (!%p1189_p7)
}
  0x28   : > { %s1193_s26 = scalar_lea.vmem %s1496_s7, 512  ;;  %p1201_p2 = scmp.lt.s32.totalorder %s1496_s7, %s1496_s7 }
  0x29   : > { %p1194_p9 = scmp.ne.s32.totalorder %s1496_s7, %s1193_s26  ;;  %p1202_p6 = scmp.lt.s32.totalorder %s1193_s26, %s1193_s26 }
  0x2b   : > { %p1196_p10 = pnand %p1194_p9, %p1519_p13  ;;  %p1203_p12 = por %p1202_p6, %p1201_p2 }
  0x2d   : > { %p1197_p1 = pneg %p1196_p10 }
  0x2f   : > { %p1204_p0 = pnand %p1203_p12, %p1197_p1 }
  0x31   : > { %1207 = shalt.err (!%p1204_p0)
}
  0x32   : > { %s1830_s30 = smov 128   ;;  %s1408_s9 = smov 8  }
  0x33   : > { %1101 = dma.hbm_to_vmem [thread:$0]  (!%p1503_p11), %s1840_s2, 512, %s1496_s7, [#allocation6], %s1830_s30, %s1830_s30, %s1408_s9  }
  0x34   : > { %s1842_s3 = sld [smem:[#allocation19_spill]] }
  0x3a   : > { %s1208_s16 = scalar_lea.hbm %s1842_s3, 512 }
  0x3b   : > { %p1209_p1 = scmp.ne.s32.totalorder %s1842_s3, %s1208_s16  ;;  %p1215_p10 = scmp.lt.u32.totalorder %s1208_s16, %s1842_s3 }
  0x3d   : > { %p1211_p2 = pnand %p1209_p1, %p1519_p13 }
  0x3f   : > { %p1212_p6 = pneg %p1211_p2 }
  0x41   : > { %p1217_p3 = pnand %p1215_p10, %p1212_p6 }
  0x43   : > { %1220 = shalt.err (!%p1217_p3)
}
  0x44   : > { %s1221_s7 = scalar_lea.vmem %s1507_s10, 512  ;;  %p1229_p12 = scmp.lt.s32.totalorder %s1507_s10, %s1507_s10 }
  0x45   : > { %p1222_p5 = scmp.ne.s32.totalorder %s1507_s10, %s1221_s7  ;;  %p1230_p0 = scmp.lt.s32.totalorder %s1221_s7, %s1221_s7 }
  0x47   : > { %p1224_p7 = pnand %p1222_p5, %p1519_p13  ;;  %p1231_p1 = por %p1230_p0, %p1229_p12 }
  0x49   : > { %p1225_p9 = pneg %p1224_p7 }
  0x4b   : > { %p1232_p2 = pnand %p1231_p1, %p1225_p9 }
  0x4d   : > { %1235 = shalt.err (!%p1232_p2)
}
  0x4e   : > { %1104 = dma.hbm_to_vmem [thread:$0]  (!%p1503_p11), %s1842_s3, 512, %s1507_s10, [#allocation9], %s1830_s30, %s1830_s30, %s1408_s9  }
  0x4f   : > { %s1843_s4 = sld [smem:[#allocation20_spill]] }
  0x55   : > { %s1236_s16 = scalar_lea.hbm %s1843_s4, 512 }
  0x56   : > { %p1237_p6 = scmp.ne.s32.totalorder %s1843_s4, %s1236_s16  ;;  %p1243_p5 = scmp.lt.u32.totalorder %s1236_s16, %s1843_s4 }
  0x58   : > { %p1239_p10 = pnand %p1237_p6, %p1519_p13 }
  0x5a   : > { %p1240_p3 = pneg %p1239_p10 }
  0x5c   : > { %p1245_p7 = pnand %p1243_p5, %p1240_p3 }
  0x5e   : > { %1248 = shalt.err (!%p1245_p7)
}
  0x5f   : > { %s1249_s7 = scalar_lea.vmem %s232_s12, 512  ;;  %p1257_p1 = scmp.lt.s32.totalorder %s232_s12, %s232_s12 }
  0x60   : > { %p1250_p9 = scmp.ne.s32.totalorder %s232_s12, %s1249_s7  ;;  %p1258_p2 = scmp.lt.s32.totalorder %s1249_s7, %s1249_s7 }
  0x62   : > { %p1252_p12 = pnand %p1250_p9, %p1519_p13  ;;  %p1259_p4 = por %p1258_p2, %p1257_p1 }
  0x64   : > { %p1253_p0 = pneg %p1252_p12 }
  0x66   : > { %p1260_p8 = pnand %p1259_p4, %p1253_p0 }
  0x68   : > { %1263 = shalt.err (!%p1260_p8)
}
  0x69   : > { %1107 = dma.hbm_to_vmem [thread:$0]  (!%p1503_p11), %s1843_s4, 512, %s232_s12, [#allocation9], %s1830_s30, %s1830_s30, %s1408_s9  }
  0x6a   : > { %s1592_s18 = sadd.s32 1, %s1402_s24   ;;  %s33_s13 = sadd.s32 1, %s1398_s23 }
  0x6b   : > { %s30_s8 = ssub.s32 %s1402_s24, %s1592_s18  ;;  %p40_p8 = scmp.ne.s32.totalorder %s1398_s23, %s1394_s22 }
  0x6c   : > { %p31_p4 = scmp.eq.s32.totalorder %s30_s8, 0  ;;  %p41_p13 = scmp.eq.s32.totalorder %s1402_s24, 0 }
  0x6d   : > { %p1122_p6 = scmp.lt.s32.totalorder %s1402_s24, 2  ;;  %p1844_p3 = scmp.eq.s32.totalorder %s1473_s25, 1 }
  0x6e   : > { %s1602_s14 = scalar_select %p31_p4, %s1398_s23, %s33_s13  }
  0x6f   : > { %p42_p10 = por %p41_p13, %p40_p8  ;;  %p1606_p5 = por %p1844_p3, %p40_p8 }
  0x70   : > { %s1611_s16 = sand.u32 1, %s1398_s23   ;;  %s983_s12 = sshll.u32 %s1402_s24, 8 }
  0x71   : > { %s1845_s15 = scalar_select %p1606_p5, 1, 0 }
  0x72   : > { %s959_s17 = sshll.u32 %s1611_s16, 4  ;;  %s1846_s0 = sld [smem:[#allocation17_spill]] }
  0x73   : > { %s252_s7 = scalar_lea.vmem [#allocation2], %s959_s17  ;;  %p1620_p11 = pnand %p1122_p6, %p42_p10 }
  0x74   : > { %s259_s10 = sshll.u32 %s252_s7, 4  ;;  %s249_s13 = scalar_lea.sflag [#allocation3], %s1611_s16  ;;  %s1624_s10 = int_to_ptr.vmem [resolvable:$true] %s259_s10 }
  0x75   : > { %p1266_p9 = pneg %p1620_p11 }
  0x78   : > { %s1618_s26 = scalar_lea.hbm %s1846_s0, %s983_s12  ;;  %s1269_s19 = scalar_lea.hbm %s1846_s0, 512 }
  0x79   : > { %s1264_s30 = scalar_lea.hbm %s1618_s26, 256  ;;  %p1270_p1 = scmp.lt.u32.totalorder %s1618_s26, %s1846_s0 }
  0x7a   : > { %p1265_p7 = scmp.ne.s32.totalorder %s1618_s26, %s1264_s30  ;;  %p1271_p2 = scmp.lt.u32.totalorder %s1269_s19, %s1264_s30 }
  0x7b   : > { %p1273_p8 = scmp.lt.u32.totalorder %s1264_s30, %s1618_s26 }
  0x7c   : > { %p1267_p12 = pnand %p1266_p9, %p1265_p7  ;;  %p1272_p4 = por %p1271_p2, %p1270_p1 }
  0x7e   : > { %p1268_p0 = pneg %p1267_p12  ;;  %p1274_p13 = por %p1273_p8, %p1272_p4 }
  0x80   : > { %p1275_p6 = pnand %p1274_p13, %p1268_p0 }
  0x82   : > { %1278 = shalt.err (!%p1275_p6)
}
  0x83   : > { %s1279_s8 = scalar_lea.vmem %s1624_s10, 256  ;;  %s1409_s12 = smov [#allocation2]  }
  0x84   : > { %p1280_p10 = scmp.ne.s32.totalorder %s1624_s10, %s1279_s8  ;;  %s1284_s17 = sshll.u32 %s1409_s12, 4  ;;  %s1285_s17 = int_to_ptr.vmem [resolvable:$false] %s1284_s17 }
  0x85   : > { %s1286_s20 = scalar_lea.vmem %s1285_s17, 512  ;;  %p1287_p12 = scmp.lt.s32.totalorder %s1624_s10, %s1285_s17 }
  0x86   : > { %p1282_p3 = pnand %p1280_p10, %p1266_p9  ;;  %p1288_p1 = scmp.lt.s32.totalorder %s1286_s20, %s1279_s8 }
  0x88   : > { %p1283_p7 = pneg %p1282_p3  ;;  %p1289_p2 = por %p1288_p1, %p1287_p12 }
  0x8a   : > { %p1290_p4 = pnand %p1289_p2, %p1283_p7 }
  0x8c   : > { %1293 = shalt.err (!%p1290_p4)
}
  0x8d   : > { %s1848_s30 = smov 128   ;;  %s962_s19 = sshll.u32 %s1611_s16, 3 }
  0x8e   : > { %1111 = dma.hbm_to_vmem [thread:$0]  (!%p1620_p11), %s1618_s26, 256, %s1624_s10, %s249_s13, %s1848_s30, %s1848_s30, %s1408_s9  }
  0x8f   : > { %s963_s7 = sshll.u32 %s1402_s24, 7  ;;  %s273_s20 = scalar_lea.vmem [#allocation5], %s962_s19 }
  0x90   : > { %s1663_s17 = scalar_lea.hbm %s1821_s1, %s963_s7  ;;  %s280_s0 = sshll.u32 %s273_s20, 4  ;;  %s281_s0 = int_to_ptr.vmem [resolvable:$true] %s280_s0 }
  0x91   : > { %s1849_s2 = sand.u32 1, %s1402_s24   ;;  %s1294_s4 = scalar_lea.hbm %s1663_s17, 128 }
  0x92   : > { %s270_s3 = scalar_lea.sflag [#allocation6], %s1849_s2  ;;  %p1295_p0 = scmp.ne.s32.totalorder %s1663_s17, %s1294_s4 }
  0x93   : > { %s1299_s26 = scalar_lea.hbm %s1821_s1, 256  ;;  %p1300_p6 = scmp.lt.u32.totalorder %s1663_s17, %s1821_s1 }
  0x94   : > { %p1297_p8 = pnand %p1295_p0, %p1266_p9  ;;  %p1301_p10 = scmp.lt.u32.totalorder %s1299_s26, %s1294_s4 }
  0x95   : > { %p1303_p7 = scmp.lt.u32.totalorder %s1294_s4, %s1663_s17 }
  0x96   : > { %p1298_p13 = pneg %p1297_p8  ;;  %p1302_p3 = por %p1301_p10, %p1300_p6 }
  0x98   : > { %p1304_p12 = por %p1303_p7, %p1302_p3 }
  0x9a   : > { %p1305_p1 = pnand %p1304_p12, %p1298_p13 }
  0x9c   : > { %1308 = shalt.err (!%p1305_p1)
}
  0x9d   : > { %s1309_s2 = scalar_lea.vmem %s281_s0, 128  ;;  %s1410_s30 = smov [#allocation5]  }
  0x9e   : > { %p1310_p2 = scmp.ne.s32.totalorder %s281_s0, %s1309_s2  ;;  %s1314_s19 = sshll.u32 %s1410_s30, 4  ;;  %s1315_s19 = int_to_ptr.vmem [resolvable:$false] %s1314_s19 }
  0x9f   : > { %s1316_s7 = scalar_lea.vmem %s1315_s19, 256  ;;  %p1317_p8 = scmp.lt.s32.totalorder %s281_s0, %s1315_s19 }
  0xa0   : > { %p1312_p4 = pnand %p1310_p2, %p1266_p9  ;;  %p1318_p5 = scmp.lt.s32.totalorder %s1316_s7, %s1309_s2 }
  0xa2   : > { %p1313_p0 = pneg %p1312_p4  ;;  %p1319_p6 = por %p1318_p5, %p1317_p8 }
  0xa4   : > { %p1320_p10 = pnand %p1319_p6, %p1313_p0 }
  0xa6   : > { %1323 = shalt.err (!%p1320_p10)
}
  0xa7   : > { %1114 = dma.hbm_to_vmem [thread:$0]  (!%p1620_p11), %s1663_s17, 128, %s281_s0, %s270_s3  }
  0xa8   : > { %p1850_p13 = scmp.ne.s32.totalorder %s1838_s29, 0 }
  0xa9   : > { %s1689_s4 = sand.u32 (!%p1850_p13), 1, %s1394_s22   ;;  %p1851_p5 = scmp.ne.s32.totalorder (!%p1850_p13), %s1836_s27, 0 }
  0xaa   : > { %289 = sbr.rel (%p1850_p13) target bundleno = 1704 (0x6a8), region = 44  ;;  %s965_s8 = sshll.u32 (!%p1850_p13), %s1689_s4, 4 }
  0xab   : > { %s292_s12 = scalar_lea.sflag (!%p1850_p13), [#allocation3], %s1689_s4  ;;  %s1693_s20 = scalar_lea.vmem (!%p1850_p13), [#allocation2], %s965_s8 }
  0xb1   : > { %1369 = dma.done.wait (%p1851_p5), %s292_s12, 256  }
  0xb2   : > { %1371 = vsyncadd (%p1851_p5), %s292_s12, 4294967040  ;;  %s300_s0 = sand.u32 1, %s1473_s25   ;;  %s966_s3 = sshll.u32 %s1689_s4, 3 }
  0xb3   : > { %s301_s29 = scalar_lea.sflag [#allocation6], %s300_s0  ;;  %s1703_s11 = scalar_lea.vmem [#allocation5], %s966_s3 }
  0xb4   : > { %1373 = dma.done.wait (%p1851_p5), %s301_s29, 128  }
  0xb5   : > { %1375 = vsyncadd (%p1851_p5), %s301_s29, 4294967168  ;;  %p1852_p11 = scmp.eq.s32.totalorder %s1473_s25, 0 }
  0xb7   : > { %1377 = dma.done.wait (%p1852_p11), [#allocation6], 512   ;;  %p1853_p9 = pmov %p1852_p11 }
  0xb9   : > { %1379 = vsyncadd (%p1853_p9), [#allocation6], 4294966784  ;;  %p1854_p3 = pmov %p1853_p9 }
  0xbb   : > { %1381 = dma.done.wait (%p1854_p3), [#allocation9], 1024   ;;  %p1855_p7 = pmov %p1854_p3 }
  0xbc   : > { %v1411_v0 = vmov 0.0|0.0   ;;  %vm1412_vm0 = vmmov 0   ;;  %v1413_v1 = vmov 0.0   ;;  %vm363_vm1 = vcmask 261120   ;;  %v438_v2 = vld [vmem:[#allocation8] sm:$0xff]  ;;  %v439_v3 = vld [vmem:[#allocation8 + $0x8] sm:$0xff] }
  0xbd   : > { %1383 = vsyncadd (%p1855_p7), [#allocation9], 4294966272  ;;  %1053 = vmatprep.subr.bf16.mxu0 %v1411_v0  ;;  %1014 = vmatprep.mubr.msk.f32.mxu0 %vm1412_vm0, %v1413_v1  ;;  %v440_v4 = vld [vmem:[#allocation8 + $0x10] sm:$0xff]  ;;  %v1059_v5 = vpack.c.bf16 %v439_v3, %v438_v2  ;;  %v441_v6 = vld [vmem:[#allocation8 + $0x18] sm:$0xff]  ;;  %v359_v17 = vlaneseq  ;;  %vm618_vm3 = vcmask 130048   ;;  %s1414_s9 = smov 32  }
  0xbe   : > { %v351_v7 = vld [vmem:[%s1693_s20] sm:$0xff]  ;;  %v1063_v9 = vpack.c.bf16 %v441_v6, %v440_v4  ;;  %v356_v10 = vld [vmem:[#allocation7 + $0x8] sm:$0xff]  ;;  %v358_v13 = vld [vmem:[#allocation7 + $0x18] sm:$0xff]  ;;  %s1415_s16 = smov 96   ;;  %s980_s26 = sshll.u32 %s1473_s25, 7 }
  0xbf   : > { %v355_v8 = vld [vmem:[#allocation7] sm:$0xff]  ;;  %1025 = vmatprep.mubr.msk.f32.mxu1 %vm363_vm1, %v351_v7  ;;  %v357_v11 = vld [vmem:[#allocation7 + $0x10] sm:$0xff]  ;;  %1060 = vmatprep.subr.bf16.mxu1 %v1059_v5  ;;  %v352_v15 = vld [vmem:[%s1693_s20 + $0x8] sm:$0xff]  ;;  %v1736_v18 = vshrl.u32 %v359_v17, 7  ;;  %s349_s10 = scalar_lea.vmem [#allocation11], %s966_s3  ;;  %s1775_s19 = scalar_lea.hbm %s1826_s6, %s980_s26 }
  0xc0   : > { %v1054_v12 = vpack.c.bf16 %v356_v10, %v355_v8  ;;  %1062 = vmatpush3.bf16.msra.mxu1 %v1059_v5  ;;  %v1057_v14 = vpack.c.bf16 %v358_v13, %v357_v11  ;;  %v1725_v16 = vld [vmem:[%s1703_s11] sm:$0xff]  ;;  %vm1069_vm2 = vmpackc.low %vm363_vm1, %vm363_vm1  ;;  %v711_v52 = vld [vmem:[#allocation10] sm:$0xff]  ;;  %s832_s13 = sshll.u32 %s349_s10, 4  ;;  %s819_s7 = scalar_lea.sflag [#allocation4], %s1689_s4  ;;  %s1777_s13 = int_to_ptr.vmem [resolvable:$true] %s832_s13 }
  0xc1   : > { %1064 = vmatprep.subr.bf16.mxu1 %v1063_v9  ;;  %v525_v19 = vsub.s32 1, %v1736_v18  ;;  %v1742_v20 = vld [vmem:[%s1825_s5] sm:$0x3f]  ;;  %v361_v22 = vsub.s32 0, %v1736_v18  ;;  %v531_v36 = vsub.s32 2, %v1736_v18  ;;  %v712_v53 = vld [vmem:[#allocation10 + $0x8] sm:$0xff] }
  0xc2   : > { %1055 = vmatpush3.bf16.msra.mxu0 %v1054_v12  ;;  %v1075_v55 = vpack.c.bf16 %v712_v53, %v711_v52  ;;  %v713_v57 = vld [vmem:[#allocation10 + $0x10] sm:$0xff]  ;;  %v714_v58 = vld [vmem:[#allocation10 + $0x18] sm:$0xff]  ;;  %v717_v62 = vsub.s32 3, %v1736_v18  ;;  %v809_v13 = vsub.s32 4, %v1736_v18  ;;  %s1324_s8 = scalar_lea.vmem %s1777_s13, 128  ;;  %p1856_p1 = scmp.ne.s32.totalorder %s1845_s15, 0 }
  0xc3   : > { %1056 = vmatprep.subr.bf16.mxu0 %v1411_v0  ;;  %v526_v21 = vrot.slane %v1742_v20, %v525_v19  ;;  %v362_v26 = vrot.slane %v1742_v20, %v361_v22  ;;  %v532_v37 = vrot.slane %v1742_v20, %v531_v36  ;;  %v1078_v59 = vpack.c.bf16 %v714_v58, %v713_v57  ;;  %p1325_p12 = scmp.ne.s32.totalorder %s1777_s13, %s1324_s8  ;;  %s1416_s25 = smov [#allocation11]  }
  0xc4   : > { %1066 = vmatpush3.bf16.msra.mxu1 %v1063_v9  ;;  %v718_v63 = vrot.slane %v1742_v20, %v717_v62  ;;  %s1328_s12 = sshll.u32 %s1416_s25, 4  ;;  %s1329_s12 = int_to_ptr.vmem [resolvable:$false] %s1328_s12 }
  0xc5   : > { %1071 = vmatprep.subr.bf16.mxu1 %v1411_v0  ;;  %p1326_p2 = pnand %p1325_p12, %p1856_p1  ;;  %s1330_s20 = scalar_lea.vmem %s1329_s12, 256 }
  0xc6   : > { %1058 = vmatpush3.bf16.msra.mxu0 %v1057_v14  ;;  %v814_v14 = vsub.s32 5, %v1736_v18  ;;  %p1331_p0 = scmp.lt.s32.totalorder %s1777_s13, %s1329_s12  ;;  %p1332_p8 = scmp.lt.s32.totalorder %s1330_s20, %s1324_s8 }
  0xc7   : > { %1067 = vmatprep.subr.bf16.mxu0 %v1411_v0  ;;  %1026 = vmatmul.mubr.msk.f32.vlgmr.msra.gmra.mrb[0].mxu1 %vm363_vm1, %v352_v15  ;;  %v810_v15 = vrot.slane %v1742_v20, %v809_v13  ;;  %p1327_p4 = pneg %p1326_p2 }
  0xc8   : > { %1039 = vmatprep.mubr.msk.f32.mxu1 %vm1412_vm0, %v1413_v1  ;;  %v815_v19 = vrot.slane %v1742_v20, %v814_v14  ;;  %p1333_p6 = por %p1332_p8, %p1331_p0 }
  0xc9   : > { %1015 = vmatmul.mubr.msk.f32.vlgmr.msra.gmra.mrb[0].mxu0 %vm363_vm1, %v1725_v16 }
  0xca   : > { %1032 = vmatprep.mubr.msk.f32.mxu0 %vm1412_vm0, %v1413_v1  ;;  %p1334_p10 = pnand %p1333_p6, %p1327_p4 }
 0x19a   : > { %v1027_v23 = vpop.f32.mrb[0].mxu1 }
 0x19b   : > { %v528_v24 = vadd.f32 %v1027_v23, %v526_v21  ;;  %v514_v25 = vpop.f32.mrb[1].mxu1 }
 0x19c   : > { %v433_v27 = vpop.f32.mrb[0].mxu0  ;;  %v527_v28 = vadd.f32 %v526_v21, %v514_v25 }
 0x19d   : > { %v1016_v29 = vpop.f32.mrb[1].mxu0  ;;  %v434_v31 = vadd.f32 %v433_v27, %v362_v26 }
 0x19e   : > { %v1068_v30 = vpack.c.bf16 %v528_v24, %v527_v28 }
 0x19f   : > { %v437_v32 = vmul.f32 0.17677669, %v434_v31 }
 0x1a0   : > { %1070 = vmatpush3.bf16.xpose.msk.msra.mxu0 %vm1069_vm2, %v1068_v30 }
 0x1a7   : > { %1033 = vmatmul.mubr.msk.f32.vlgmr.msra.gmra.mrb[2].mxu0 %vm363_vm1, %v437_v32 }
 0x27a   : > { %v614_v33 = vpop.f32.mrb[2].mxu0 }
 0x27b   : > { %v1034_v34 = vpop.f32.mrb[3].mxu0  ;;  %v619_v35 = vsel %vm618_vm3, %v614_v33, -inf }
 0x27c   : > { %620 = vmax.xlane.f32.xlu0 %v619_v35 }
 0x292   : > { %534 = vrot.lane.b32.xlu0 %v532_v37, %s1414_s9 }
 0x309   : > { %v621_v38 = vpop.xlane.xlu0 %620 }
 0x30a   : > { %v622_v39 = vsub.f32 %v614_v33, %v621_v38 }
 0x30c   : > { %v623_v40 = vmul.f32 1.442695, %v622_v39 }
 0x30d   : > { %v535_v41 = vpop.permute.xlu0 %534 }
 0x30e   : > { %1174 = vpow2.f32 %v623_v40  ;;  %v537_v42 = vadd.f32 %v535_v41, %v514_v25  ;;  %v538_v43 = vadd.f32 %v1027_v23, %v535_v41 }
 0x310   : > { %v1169_v44 = vpack.i.bf16 %v538_v43, %v537_v42 }
 0x318   : > { %v1175_v45 = vpop.eup %1174 }
 0x319   : > { %v625_v46 = vsel %vm618_vm3, %v1175_v45, 0.0 }
 0x31a   : > { %626 = vadd.xlane.f32.xlu1 %v625_v46 }
 0x32b   : > { %1170 = vrot.lane.b32.xlu1 %v1169_v44, %s1415_s16 }
 0x3a7   : > { %v627_v47 = vpop.xlane.xlu1 %626 }
 0x3a8   : > { %1176 = vrcp.f32 %v627_v47 }
 0x3ab   : > { %v1171_v48 = vpop.permute.xlu1 %1170 }
 0x3ac   : > { %v1173_v49 = vunpack.i.h.bf16 %v1171_v48  ;;  %v1172_v50 = vunpack.i.l.bf16 %v1171_v48 }
 0x3ae   : > { %v1072_v51 = vpack.c.bf16 %v1173_v49, %v1172_v50 }
 0x3b0   : > { %1073 = vmatpush3.bf16.msra.mxu1 %v1072_v51 }
 0x3b1   : > { %1074 = vmatprep.subr.bf16.mxu1 %v1411_v0 }
 0x3b2   : > { %v1177_v54 = vpop.eup %1176 }
 0x3b3   : > { %v629_v56 = vmul.f32 %v1177_v54, %v1175_v45 }
 0x3b5   : > { %1040 = vmatmul.mubr.msk.f32.vlgmr.msra.gmra.mrb[2].mxu1 %vm618_vm3, %v629_v56 }
 0x3b6   : > { %1076 = vmatpush3.bf16.msra.mxu1 %v1075_v55  ;;  %1050 = vmatprep.mubr.msk.f32.mxu1 %vm1412_vm0, %v1413_v1 }
 0x3b7   : > { %1077 = vmatprep.subr.bf16.mxu1 %v1411_v0 }
 0x3ba   : > { %1079 = vmatpush3.bf16.msra.mxu1 %v1078_v59 }
 0x488   : > { %v707_v60 = vpop.f32.mrb[2].mxu1 }
 0x489   : > { %v1041_v61 = vpop.f32.mrb[3].mxu1  ;;  %1051 = vmatmul.mubr.msk.f32.vlgmr.msra.gmra.mrb[4].mxu1 %vm363_vm1, %v707_v60 }
 0x55c   : > { %v788_v2 = vpop.f32.mrb[4].mxu1 }
 0x55d   : > { %v789_v3 = vadd.f32 %v788_v2, %v718_v63  ;;  %v1052_v4 = vpop.f32.mrb[5].mxu1 }
 0x55f   : > { %v792_v5 = vadd.f32 %v789_v3, %v1725_v16 }
 0x561   : > { %v793_v6 = vsel %vm363_vm1, %v792_v5, 0.0 }
 0x562   : > { %794 = vadd.xlane.f32.xlu1 %v793_v6 }
 0x5ef   : > { %v795_v1 = vpop.xlane.xlu1 %794 }
 0x5f0   : > { %v797_v0 = vmul.f32 0.03125, %v795_v1 }
 0x5f2   : > { %v798_v7 = vsub.f32 %v792_v5, %v797_v0 }
 0x5f4   : > { %v799_v8 = vmul.f32 %v798_v7, %v798_v7 }
 0x5f6   : > { %v800_v9 = vsel %vm363_vm1, %v799_v8, 0.0 }
 0x5f7   : > { %801 = vadd.xlane.f32.xlu0 %v800_v9 }
 0x684   : > { %v802_v10 = vpop.xlane.xlu0 %801 }
 0x685   : > { %v803_v11 = vmul.f32 0.03125, %v802_v10 }
 0x687   : > { %v804_v12 = vadd.f32 1e-05, %v803_v11 }
 0x689   : > { %1178 = vrsqrt.f32 %v804_v12 }
 0x693   : > { %v1179_v16 = vpop.eup %1178 }
 0x694   : > { %v806_v17 = vmul.f32 %v1179_v16, %v798_v7 }
 0x696   : > { %v811_v21 = vmul.f32 %v810_v15, %v806_v17 }
 0x698   : > { %v816_v22 = vadd.f32 %v815_v19, %v811_v21 }
 0x69a   : > { %817 = vst.msk [vmem:[%s349_s10] sm:$0xff] %vm363_vm1, %v816_v22 }
 0x69b   : > { %1337 = shalt.err (!%p1334_p10)
}
 0x69c   : > { %s1338_s4 = scalar_lea.hbm %s1775_s19, 128  ;;  %s1342_s29 = scalar_lea.hbm %s1826_s6, 256 }
 0x69d   : > { %p1339_p13 = scmp.ne.s32.totalorder %s1775_s19, %s1338_s4  ;;  %p1343_p9 = scmp.lt.u32.totalorder %s1775_s19, %s1826_s6 }
 0x69e   : > { %p1344_p3 = scmp.lt.u32.totalorder %s1342_s29, %s1338_s4  ;;  %p1346_p12 = scmp.lt.u32.totalorder %s1338_s4, %s1775_s19 }
 0x69f   : > { %p1340_p5 = pnand %p1339_p13, %p1856_p1 }
 0x6a0   : > { %p1345_p7 = por %p1344_p3, %p1343_p9 }
 0x6a1   : > { %p1341_p11 = pneg %p1340_p5 }
 0x6a2   : > { %p1347_p2 = por %p1346_p12, %p1345_p7 }
 0x6a4   : > { %p1348_p4 = pnand %p1347_p2, %p1341_p11 }
 0x6a6   : > { %1351 = shalt.err (!%p1348_p4)
}
 0x6a7   : > { %1096 = dma.vmem_to_hbm [thread:$0]  (%p1856_p1), %s1777_s13, 128, %s1775_s19, %s819_s7  }
 0x6a8 PF: > { %s844_s17 = sand.u32 1, %s1390_s21   ;;  %p1857_p0 = scmp.ne.s32.totalorder %s1837_s28, 0 }
 0x6a9   : > { %p1858_p8 = scmp.ge.s32.totalorder %s1402_s24, 2  ;;  %s845_s9 = scalar_lea.sflag [#allocation4], %s844_s17 }
 0x6ab   : > { %p1116_p6 = pnand %p1858_p8, %p1857_p0 }
 0x6ad   : > { %1385 = dma.done.wait (!%p1116_p6), %s845_s9, 128  }
 0x6ae   : > { %1387 = vsyncadd (!%p1116_p6), %s845_s9, 4294967168  ;;  %p23_p10 = scmp.ge.s32.totalorder %s1592_s18, 4   ;;  %s1859_s21 = smov %s1394_s22 }
 0x6af   : > { %s1860_s22 = smov %s1398_s23  ;;  %s1861_s23 = smov %s1602_s14 }
 0x6b0   : > { %s1862_s24 = smov %s1592_s18  ;;  %25 = sbr.rel (!%p23_p10) target bundleno = 13 (0xd), region = 114 }
 0x6b7   :  { %850 = vsyncpa [#allocation3], 1 }
 0x6b8   :  { %852 = vsyncpa [#allocation3 + $0x1], 1 }
 0x6b9   :  { %853 = vsyncpa [#allocation6], 1 }
 0x6ba   :  { %855 = vsyncpa [#allocation6 + $0x1], 1 }
 0x6bb   :  { %856 = vsyncpa [#allocation9], 1 }
 0x6bc   :  { %857 = vsyncpa [#allocation4], 1 }
 0x6bd   :  { %859 = vsyncpa [#allocation4 + $0x1], 1 }

</bundles_post_ra>
